<compile_context>
chip_gen: v7x
topology: tpu7x:2x2x1
jax: 0.10.0
libtpu: 0.0.40
codegen_flags: <defaults>
</compile_context>

<pallas_src>
import jax
import jax.numpy as jnp
from jax.experimental import pallas as pl
from jax.experimental.pallas import tpu as pltpu


def _pwff_kernel(x_ref, w1_ref, b1_ref, w2_ref, b2_ref, o_ref):
    # x_ref: (tm, H) x.dtype; w*_ref: (H, H) bf16; b*_ref: (1, H) f32; o_ref: (tm, H) x.dtype
    x = x_ref[...]
    xf = x.astype(jnp.float32)                              # residual kept in f32
    h = jnp.dot(x.astype(w1_ref.dtype), w1_ref[...],
                preferred_element_type=jnp.float32)
    h = jnp.maximum(h + b1_ref[...], 0.0)                   # bias + ReLU on VPU (f32)
    y = jnp.dot(h.astype(w2_ref.dtype), w2_ref[...],
                preferred_element_type=jnp.float32)
    o_ref[...] = (y + b2_ref[...] + xf).astype(o_ref.dtype)


def _round_up(v, m):
    return ((v + m - 1) // m) * m


def pointwise_feedforward(x, w1, b1, w2, b2, *, compute_dtype=jnp.bfloat16):
    """x: (B, S, H).  w1/w2: (H, H) stored as (in, out).  b1/b2: (H,)."""
    B, S, H = x.shape
    M = B * S
    xbytes = jnp.dtype(x.dtype).itemsize
    obytes = xbytes
    wbytes = jnp.dtype(compute_dtype).itemsize

    # Rows: pad only when B*S is not a multiple of 8 (sublane granularity).
    Mp = _round_up(M, 8)
    x2 = x.reshape(M, H)
    if Mp != M:
        x2 = jnp.pad(x2, ((0, Mp - M), (0, 0)))

    # --- row tile: stream ~4 MiB of activations (x + out) per grid step -----
    row_stream = H * (xbytes + obytes)
    tm = (4 << 20) // max(1, row_stream)
    tm = max(256, min(4096, _round_up(tm, 256)))
    tm = min(tm, Mp)
    tm = max(8, (tm // 8) * 8)
    # Guarantee >= 2 grid steps so the parallel axis can use both v7x TCs.
    if Mp > 8 and pl.cdiv(Mp, tm) < 2:
        tm = _round_up(pl.cdiv(Mp, 2), 8)

    # --- generation-aware VMEM budget ----------------------------------------
    try:
        vmem_cap = int(pltpu.get_tpu_info().vmem_capacity_bytes)
    except Exception:
        vmem_cap = 64 << 20                       # conservative (v7x per-TC)
    ws_budget = (vmem_cap * 3) // 4               # ~48 MiB v7x, ~96 MiB v5e/v6e

    def _ws_bytes(t, weight_bufs):
        io = 2 * t * H * (xbytes + obytes)        # double-buffered activation stream
        tmp = t * H * (4 + 4 + 2 * wbytes)        # f32 intermediates + bf16 copies
        w = weight_bufs * 2 * H * H * wbytes      # W1 + W2
        b = weight_bufs * 2 * H * 4               # b1 + b2
        return io + tmp + w + b

    while tm > 8 and _ws_bytes(tm, 1) > ws_budget:
        tm = max(8, (tm // 2 // 8) * 8)

    grid = (pl.cdiv(Mp, tm),)

    vmem_limit = int(min(vmem_cap - (4 << 20),
                         max(_ws_bytes(tm, 2) + (4 << 20),
                             min(ws_budget + (8 << 20), vmem_cap - (8 << 20)))))
    vmem_limit = max(vmem_limit, 16 << 20)

    # Weights stored as (in, out); bf16 for the MXU.  Biases stay f32.
    w1c = w1.astype(compute_dtype)
    w2c = w2.astype(compute_dtype)
    b1c = b1.reshape(1, H).astype(jnp.float32)
    b2c = b2.reshape(1, H).astype(jnp.float32)

    cost = pl.CostEstimate(
        flops=4 * Mp * H * H,                                     # two (Mp,H)x(H,H) matmuls
        transcendentals=0,
        bytes_accessed=Mp * H * (xbytes + obytes) + 2 * H * H * wbytes + 2 * H * 4,
    )

    def _run(single_buffer_weights):
        wkw = {"pipeline_mode": pl.Buffered(1)} if single_buffer_weights else {}
        in_specs = [
            pl.BlockSpec((tm, H), lambda i: (i, 0)),              # x tile (streamed)
            pl.BlockSpec((H, H), lambda i: (0, 0), **wkw),        # W1 (resident)
            pl.BlockSpec((1, H), lambda i: (0, 0), **wkw),        # b1 (resident)
            pl.BlockSpec((H, H), lambda i: (0, 0), **wkw),        # W2 (resident)
            pl.BlockSpec((1, H), lambda i: (0, 0), **wkw),        # b2 (resident)
        ]
        return pl.pallas_call(
            _pwff_kernel,
            out_shape=jax.ShapeDtypeStruct((Mp, H), x.dtype),
            grid_spec=pltpu.PrefetchScalarGridSpec(
                num_scalar_prefetch=0,
                grid=grid,
                in_specs=in_specs,
                out_specs=pl.BlockSpec((tm, H), lambda i: (i, 0)),
            ),
            compiler_params=pltpu.CompilerParams(
                dimension_semantics=("parallel",),
                vmem_limit_bytes=vmem_limit,
            ),
            cost_estimate=cost,
        )(x2, w1c, b1c, w2c, b2c)

    try:
        out2 = _run(True)      # preferred: single-buffered resident weights
    except Exception:
        out2 = _run(False)     # fallback: default double-buffering

    if Mp != M:
        out2 = out2[:M]
    return out2.reshape(B, S, H)


def init_params(key, hidden_units):
    """Deterministic init matching PyTorch Conv1d default (kaiming uniform,
    fan_in = hidden_units * kernel_size = hidden_units)."""
    k1, k2, k3, k4 = jax.random.split(key, 4)
    bound = 1.0 / (hidden_units ** 0.5)
    # PyTorch conv weight is (out, in, 1); we store the transposed (in, out).
    w1 = jax.random.uniform(k1, (hidden_units, hidden_units),
                            minval=-bound, maxval=bound, dtype=jnp.float32)
    b1 = jax.random.uniform(k2, (hidden_units,),
                            minval=-bound, maxval=bound, dtype=jnp.float32)
    w2 = jax.random.uniform(k3, (hidden_units, hidden_units),
                            minval=-bound, maxval=bound, dtype=jnp.float32)
    b2 = jax.random.uniform(k4, (hidden_units,),
                            minval=-bound, maxval=bound, dtype=jnp.float32)
    return w1, b1, w2, b2


if __name__ == "__main__":
    key = jax.random.PRNGKey(0)
    kx, kp = jax.random.split(key)

    B, S, H = 2, 8, 32          # batch, seq_len, hidden_units
    x = jax.random.normal(kx, (B, S, H), dtype=jnp.float32)
    w1, b1, w2, b2 = init_params(kp, H)

    out = jax.block_until_ready(pointwise_feedforward(x, w1, b1, w2, b2))
    assert out.shape == (B, S, H)

    # Pure-JAX reference with the same bf16-operand / f32-accumulate math path.
    bf16 = jnp.bfloat16
    x2 = x.reshape(B * S, H)
    h_ref = jnp.maximum(
        jnp.dot(x2.astype(bf16), w1.astype(bf16),
                preferred_element_type=jnp.float32) + b1, 0.0)
    y_ref = jnp.dot(h_ref.astype(bf16), w2.astype(bf16),
                    preferred_element_type=jnp.float32) + b2
    ref = (y_ref + x2).reshape(B, S, H)
    assert jnp.allclose(out, ref, atol=2e-2, rtol=2e-2), "mismatch vs reference"

    # Also sanity-check against the full-f32 reference with bf16-level tolerance.
    ref_f32 = jnp.maximum(x @ w1 + b1, 0.0) @ w2 + b2 + x
    assert jnp.allclose(out, ref_f32, atol=5e-2, rtol=5e-2), "mismatch vs f32 reference"

    print("KERNEL_OK")
</pallas_src>

<mosaic_0001>
module attributes {stable_mosaic.version = 11 : i64} {
  func.func @_pwff_kernel(%arg0: i32, %arg1: memref<8x32xf32, #tpu.memory_space<vmem>>, %arg2: memref<32x32xbf16, #tpu.memory_space<vmem>>, %arg3: memref<1x32xf32, #tpu.memory_space<vmem>>, %arg4: memref<32x32xbf16, #tpu.memory_space<vmem>>, %arg5: memref<1x32xf32, #tpu.memory_space<vmem>>, %arg6: memref<8x32xf32, #tpu.memory_space<vmem>>) attributes {dimension_semantics = [#tpu.dimension_semantics<parallel>], iteration_bounds = array<i64: 2>, scalar_prefetch = 0 : i64, scratch_operands = 0 : i64, tpu.core_type = #tpu.core_type<tc>, window_params = [{transform_indices = @transform_0, window_bounds = array<i64: 8, 32>}, {pipeline_mode = #tpu.pipeline_mode<synchronous>, transform_indices = @transform_1, window_bounds = array<i64: 32, 32>}, {pipeline_mode = #tpu.pipeline_mode<synchronous>, transform_indices = @transform_2, window_bounds = array<i64: 1, 32>}, {pipeline_mode = #tpu.pipeline_mode<synchronous>, transform_indices = @transform_3, window_bounds = array<i64: 32, 32>}, {pipeline_mode = #tpu.pipeline_mode<synchronous>, transform_indices = @transform_4, window_bounds = array<i64: 1, 32>}, {transform_indices = @transform_5, window_bounds = array<i64: 8, 32>}]} {
    %c0 = arith.constant 0 : index
    %c0_0 = arith.constant 0 : index
    %0 = vector.load %arg1[%c0, %c0_0] : memref<8x32xf32, #tpu.memory_space<vmem>>, vector<8x32xf32>
    %1 = arith.truncf %0 : vector<8x32xf32> to vector<8x32xbf16>
    %c0_1 = arith.constant 0 : index
    %c0_2 = arith.constant 0 : index
    %2 = vector.load %arg2[%c0_1, %c0_2] : memref<32x32xbf16, #tpu.memory_space<vmem>>, vector<32x32xbf16>
    %cst = arith.constant dense<0.000000e+00> : vector<8x32xf32>
    %3 = tpu.matmul %1, %2, %cst {dimension_numbers = #tpu.dot_dimension_numbers<[1], [0], [0], [1], [0, 0, 1, 1], [], []>} : vector<8x32xbf16>, vector<32x32xbf16>, vector<8x32xf32> -> vector<8x32xf32>
    %c0_3 = arith.constant 0 : index
    %c0_4 = arith.constant 0 : index
    %4 = vector.load %arg3[%c0_3, %c0_4] : memref<1x32xf32, #tpu.memory_space<vmem>>, vector<1x32xf32>
    %5 = vector.broadcast %4 : vector<1x32xf32> to vector<8x32xf32>
    %6 = arith.addf %3, %5 : vector<8x32xf32>
    %cst_5 = arith.constant 0.000000e+00 : f32
    %7 = vector.broadcast %cst_5 : f32 to vector<8x32xf32>
    %8 = arith.maximumf %6, %7 : vector<8x32xf32>
    %9 = arith.truncf %8 : vector<8x32xf32> to vector<8x32xbf16>
    %c0_6 = arith.constant 0 : index
    %c0_7 = arith.constant 0 : index
    %10 = vector.load %arg4[%c0_6, %c0_7] : memref<32x32xbf16, #tpu.memory_space<vmem>>, vector<32x32xbf16>
    %cst_8 = arith.constant dense<0.000000e+00> : vector<8x32xf32>
    %11 = tpu.matmul %9, %10, %cst_8 {dimension_numbers = #tpu.dot_dimension_numbers<[1], [0], [0], [1], [0, 0, 1, 1], [], []>} : vector<8x32xbf16>, vector<32x32xbf16>, vector<8x32xf32> -> vector<8x32xf32>
    %c0_9 = arith.constant 0 : index
    %c0_10 = arith.constant 0 : index
    %12 = vector.load %arg5[%c0_9, %c0_10] : memref<1x32xf32, #tpu.memory_space<vmem>>, vector<1x32xf32>
    %13 = vector.broadcast %12 : vector<1x32xf32> to vector<8x32xf32>
    %14 = arith.addf %11, %13 : vector<8x32xf32>
    %15 = arith.addf %14, %0 : vector<8x32xf32>
    %c0_11 = arith.constant 0 : index
    %c0_12 = arith.constant 0 : index
    %16 = vector.load %arg6[%c0_11, %c0_12] : memref<8x32xf32, #tpu.memory_space<vmem>>, vector<8x32xf32>
    tpu.vector_store %arg6[%c0_11, %c0_12], %15 {strides = array<i32>} : memref<8x32xf32, #tpu.memory_space<vmem>>, vector<8x32xf32>,
    return
  }
  func.func @transform_0(%arg0: i32) -> (i32, i32) {
    %c0_i32 = arith.constant 0 : i32
    %c0_i32_0 = arith.constant 0 : i32
    return %arg0, %c0_i32 : i32, i32
  }
  func.func @transform_1(%arg0: i32) -> (i32, i32) {
    %c0_i32 = arith.constant 0 : i32
    %c0_i32_0 = arith.constant 0 : i32
    %c0_i32_1 = arith.constant 0 : i32
    return %c0_i32, %c0_i32_0 : i32, i32
  }
  func.func @transform_2(%arg0: i32) -> (i32, i32) {
    %c0_i32 = arith.constant 0 : i32
    %c0_i32_0 = arith.constant 0 : i32
    %c0_i32_1 = arith.constant 0 : i32
    return %c0_i32, %c0_i32_0 : i32, i32
  }
  func.func @transform_3(%arg0: i32) -> (i32, i32) {
    %c0_i32 = arith.constant 0 : i32
    %c0_i32_0 = arith.constant 0 : i32
    %c0_i32_1 = arith.constant 0 : i32
    return %c0_i32, %c0_i32_0 : i32, i32
  }
  func.func @transform_4(%arg0: i32) -> (i32, i32) {
    %c0_i32 = arith.constant 0 : i32
    %c0_i32_0 = arith.constant 0 : i32
    %c0_i32_1 = arith.constant 0 : i32
    return %c0_i32, %c0_i32_0 : i32, i32
  }
  func.func @transform_5(%arg0: i32) -> (i32, i32) {
    %c0_i32 = arith.constant 0 : i32
    %c0_i32_0 = arith.constant 0 : i32
    return %arg0, %c0_i32 : i32, i32
  }
}

module attributes {stable_mosaic.version = 11 : i64} {
  func.func @_pwff_kernel(%arg0: i32, %arg1: memref<8x32xf32, #tpu.memory_space<vmem>>, %arg2: memref<32x32xbf16, #tpu.memory_space<vmem>>, %arg3: memref<1x32xf32, #tpu.memory_space<vmem>>, %arg4: memref<32x32xbf16, #tpu.memory_space<vmem>>, %arg5: memref<1x32xf32, #tpu.memory_space<vmem>>, %arg6: memref<8x32xf32, #tpu.memory_space<vmem>>) attributes {dimension_semantics = [#tpu.dimension_semantics<parallel>], iteration_bounds = array<i64: 2>, scalar_prefetch = 0 : i64, scratch_operands = 0 : i64, tpu.core_type = #tpu.core_type<tc>, window_params = [{transform_indices = @transform_0, window_bounds = array<i64: 8, 32>}, {pipeline_mode = #tpu.pipeline_mode<synchronous>, transform_indices = @transform_1, window_bounds = array<i64: 32, 32>}, {pipeline_mode = #tpu.pipeline_mode<synchronous>, transform_indices = @transform_2, window_bounds = array<i64: 1, 32>}, {pipeline_mode = #tpu.pipeline_mode<synchronous>, transform_indices = @transform_3, window_bounds = array<i64: 32, 32>}, {pipeline_mode = #tpu.pipeline_mode<synchronous>, transform_indices = @transform_4, window_bounds = array<i64: 1, 32>}, {transform_indices = @transform_5, window_bounds = array<i64: 8, 32>}]} {
    %c0 = arith.constant 0 : index
    %c0_0 = arith.constant 0 : index
    %0 = vector.load %arg1[%c0, %c0_0] : memref<8x32xf32, #tpu.memory_space<vmem>>, vector<8x32xf32>
    %1 = arith.truncf %0 : vector<8x32xf32> to vector<8x32xbf16>
    %c0_1 = arith.constant 0 : index
    %c0_2 = arith.constant 0 : index
    %2 = vector.load %arg2[%c0_1, %c0_2] : memref<32x32xbf16, #tpu.memory_space<vmem>>, vector<32x32xbf16>
    %cst = arith.constant dense<0.000000e+00> : vector<8x32xf32>
    %3 = tpu.matmul %1, %2, %cst {dimension_numbers = #tpu.dot_dimension_numbers<[1], [0], [0], [1], [0, 0, 1, 1], [], []>} : vector<8x32xbf16>, vector<32x32xbf16>, vector<8x32xf32> -> vector<8x32xf32>
    %c0_3 = arith.constant 0 : index
    %c0_4 = arith.constant 0 : index
    %4 = vector.load %arg3[%c0_3, %c0_4] : memref<1x32xf32, #tpu.memory_space<vmem>>, vector<1x32xf32>
    %5 = vector.broadcast %4 : vector<1x32xf32> to vector<8x32xf32>
    %6 = arith.addf %3, %5 : vector<8x32xf32>
    %cst_5 = arith.constant 0.000000e+00 : f32
    %7 = vector.broadcast %cst_5 : f32 to vector<8x32xf32>
    %8 = arith.maximumf %6, %7 : vector<8x32xf32>
    %9 = arith.truncf %8 : vector<8x32xf32> to vector<8x32xbf16>
    %c0_6 = arith.constant 0 : index
    %c0_7 = arith.constant 0 : index
    %10 = vector.load %arg4[%c0_6, %c0_7] : memref<32x32xbf16, #tpu.memory_space<vmem>>, vector<32x32xbf16>
    %cst_8 = arith.constant dense<0.000000e+00> : vector<8x32xf32>
    %11 = tpu.matmul %9, %10, %cst_8 {dimension_numbers = #tpu.dot_dimension_numbers<[1], [0], [0], [1], [0, 0, 1, 1], [], []>} : vector<8x32xbf16>, vector<32x32xbf16>, vector<8x32xf32> -> vector<8x32xf32>
    %c0_9 = arith.constant 0 : index
    %c0_10 = arith.constant 0 : index
    %12 = vector.load %arg5[%c0_9, %c0_10] : memref<1x32xf32, #tpu.memory_space<vmem>>, vector<1x32xf32>
    %13 = vector.broadcast %12 : vector<1x32xf32> to vector<8x32xf32>
    %14 = arith.addf %11, %13 : vector<8x32xf32>
    %15 = arith.addf %14, %0 : vector<8x32xf32>
    %c0_11 = arith.constant 0 : index
    %c0_12 = arith.constant 0 : index
    %16 = vector.load %arg6[%c0_11, %c0_12] : memref<8x32xf32, #tpu.memory_space<vmem>>, vector<8x32xf32>
    tpu.vector_store %arg6[%c0_11, %c0_12], %15 {strides = array<i32>} : memref<8x32xf32, #tpu.memory_space<vmem>>, vector<8x32xf32>,
    return
  }
  func.func @transform_0(%arg0: i32) -> (i32, i32) {
    %c0_i32 = arith.constant 0 : i32
    %c0_i32_0 = arith.constant 0 : i32
    return %arg0, %c0_i32 : i32, i32
  }
  func.func @transform_1(%arg0: i32) -> (i32, i32) {
    %c0_i32 = arith.constant 0 : i32
    %c0_i32_0 = arith.constant 0 : i32
    %c0_i32_1 = arith.constant 0 : i32
    return %c0_i32, %c0_i32_0 : i32, i32
  }
  func.func @transform_2(%arg0: i32) -> (i32, i32) {
    %c0_i32 = arith.constant 0 : i32
    %c0_i32_0 = arith.constant 0 : i32
    %c0_i32_1 = arith.constant 0 : i32
    return %c0_i32, %c0_i32_0 : i32, i32
  }
  func.func @transform_3(%arg0: i32) -> (i32, i32) {
    %c0_i32 = arith.constant 0 : i32
    %c0_i32_0 = arith.constant 0 : i32
    %c0_i32_1 = arith.constant 0 : i32
    return %c0_i32, %c0_i32_0 : i32, i32
  }
  func.func @transform_4(%arg0: i32) -> (i32, i32) {
    %c0_i32 = arith.constant 0 : i32
    %c0_i32_0 = arith.constant 0 : i32
    %c0_i32_1 = arith.constant 0 : i32
    return %c0_i32, %c0_i32_0 : i32, i32
  }
  func.func @transform_5(%arg0: i32) -> (i32, i32) {
    %c0_i32 = arith.constant 0 : i32
    %c0_i32_0 = arith.constant 0 : i32
    return %arg0, %c0_i32 : i32, i32
  }
}

</mosaic_0001>

<bundles_post_ra>
// kernel: tpu_custom_call.1
= control target key start
LH: loop header
LB: loop body
LE: loop exit
PB: predicated region body
PF: predicated region fallthrough
CT: control target
= control target key end

     0   :  { %10 = vsyncpa [#allocation3], 0  ;;  %s1071_s0 = inlined_call_operand.hbm [shape: f32[16,32], index: 0, kind: input, shape index: {}]   ;;  %s1072_s1 = inlined_call_operand.hbm [shape: bf16[32,32], index: 1, kind: input, shape index: {}]   ;;  %s1073_s2 = inlined_call_operand.vmem [shape: f32[1,32], index: 2, kind: input, shape index: {}]   ;;  %s1074_s3 = inlined_call_operand.hbm [shape: bf16[32,32], index: 3, kind: input, shape index: {}]   ;;  %s1075_s4 = inlined_call_operand.vmem [shape: f32[1,32], index: 4, kind: input, shape index: {}]   ;;  %s1076_s5 = inlined_call_operand.hbm [shape: f32[16,32], index: 5, kind: output, shape index: {}]  }
   0x1   :  { %12 = vsyncpa [#allocation3 + $0x1], 0 }
   0x2   :  { %13 = vsyncpa [#allocation6], 0 }
   0x3   :  { %14 = vsyncpa [#allocation4], 0 }
   0x4   :  { %16 = vsyncpa [#allocation4 + $0x1], 0  ;;  %s829_s18 = smov 0   ;;  %s831_s19 = smov 0  }
   0x5   :  { %s833_s20 = smov 0   ;;  %s835_s21 = smov 0  }
   0x6 LB: > { %s850_s22 = sadd.s32 4294967295, %s789_s21   ;;  %s512_s23 = sadd.s32 4294967294, %s789_s21   ;;  %s789_s21 = sphi %s835_s21, %s1096_s21   ;;  %s785_s20 = sphi %s833_s20, %s1095_s20   ;;  %s781_s19 = sphi %s831_s19, %s1094_s19   ;;  %s777_s18 = sphi %s829_s18, %s1093_s18  }
   0x7   : > { %p42_p0 = scmp.ne.s32.totalorder %s781_s19, %s777_s18  ;;  %p1077_p1 = scmp.eq.s32.totalorder %s850_s22, 0 }
   0x8   : > { %p156_p3 = scmp.eq.s32.totalorder %s512_s23, 1  ;;  %p513_p5 = scmp.ge.s32.totalorder %s789_s21, 1 }
   0x9   : > { %p859_p4 = por %p1077_p1, %p42_p0  ;;  %p163_p7 = scmp.lt.s32.totalorder %s789_s21, 3 }
   0xa   : > { %p864_p6 = por %p156_p3, %p42_p0  ;;  %s791_s27 = smov [#allocation5]  }
   0xb   : > { %s1080_s24 = scalar_select %p859_p4, 1, 0 }
   0xc   : > { %s1081_s25 = scalar_select %p864_p6, 1, 0 }
   0xd   : > { %p869_p8 = pnand %p513_p5, %p163_p7  ;;  %s175_s28 = sshll.u32 %s791_s27, 4  ;;  %s873_s28 = int_to_ptr.vmem [resolvable:$true] %s175_s28 }
   0xe   : > { %s792_s30 = smov [#allocation7]   ;;  %s633_s9 = scalar_lea.hbm %s1072_s1, 256 }
   0xf   : > { %p570_p9 = pneg %p869_p8  ;;  %s191_s6 = sshll.u32 %s792_s30, 4  ;;  %s884_s6 = int_to_ptr.vmem [resolvable:$true] %s191_s6 }
  0x10   : > { %p634_p12 = scmp.ne.s32.totalorder %s1072_s1, %s633_s9  ;;  %p640_p5 = scmp.lt.u32.totalorder %s633_s9, %s1072_s1 }
  0x11   : > { %p880_p11 = pnand %p570_p9, %p1077_p1 }
  0x13   : > { %p635_p13 = pneg %p880_p11 }
  0x15   : > { %p636_p0 = pnand %p635_p13, %p634_p12 }
  0x17   : > { %p637_p3 = pneg %p636_p0 }
  0x19   : > { %p642_p7 = pnand %p640_p5, %p637_p3 }
  0x1b   : > { %645 = shalt.err (!%p642_p7)
}
  0x1c   : > { %s646_s14 = scalar_lea.vmem %s873_s28, 256  ;;  %p654_p2 = scmp.lt.s32.totalorder %s873_s28, %s873_s28 }
  0x1d   : > { %p647_p9 = scmp.ne.s32.totalorder %s873_s28, %s646_s14  ;;  %p655_p12 = scmp.lt.s32.totalorder %s646_s14, %s646_s14 }
  0x1f   : > { %p649_p10 = pnand %p647_p9, %p635_p13  ;;  %p656_p0 = por %p655_p12, %p654_p2 }
  0x21   : > { %p650_p1 = pneg %p649_p10 }
  0x23   : > { %p657_p6 = pnand %p656_p0, %p650_p1 }
  0x25   : > { %660 = shalt.err (!%p657_p6)
}
  0x26   : > { %s793_s15 = smov 64   ;;  %s794_s16 = smov 4  }
  0x27   : > { %573 = dma.hbm_to_vmem [thread:$0]  (!%p880_p11), %s1072_s1, 256, %s873_s28, [#allocation6], %s793_s15, %s793_s15, %s794_s16  }
  0x28   : > { %s661_s7 = scalar_lea.hbm %s1074_s3, 256 }
  0x29   : > { %p662_p2 = scmp.ne.s32.totalorder %s1074_s3, %s661_s7  ;;  %p668_p10 = scmp.lt.u32.totalorder %s661_s7, %s1074_s3 }
  0x2b   : > { %p664_p1 = pnand %p662_p2, %p635_p13 }
  0x2d   : > { %p665_p6 = pneg %p664_p1 }
  0x2f   : > { %p670_p3 = pnand %p668_p10, %p665_p6 }
  0x31   : > { %673 = shalt.err (!%p670_p3)
}
  0x32   : > { %s674_s28 = scalar_lea.vmem %s884_s6, 256  ;;  %p682_p12 = scmp.lt.s32.totalorder %s884_s6, %s884_s6 }
  0x33   : > { %p675_p5 = scmp.ne.s32.totalorder %s884_s6, %s674_s28  ;;  %p683_p0 = scmp.lt.s32.totalorder %s674_s28, %s674_s28 }
  0x35   : > { %p677_p7 = pnand %p675_p5, %p635_p13  ;;  %p684_p2 = por %p683_p0, %p682_p12 }
  0x37   : > { %p678_p9 = pneg %p677_p7 }
  0x39   : > { %p685_p1 = pnand %p684_p2, %p678_p9 }
  0x3b   : > { %688 = shalt.err (!%p685_p1)
}
  0x3c   : > { %576 = dma.hbm_to_vmem [thread:$0]  (!%p880_p11), %s1074_s3, 256, %s884_s6, [#allocation6], %s793_s15, %s793_s15, %s794_s16  }
  0x3d   : > { %s939_s14 = sadd.s32 1, %s789_s21   ;;  %s29_s29 = sadd.s32 1, %s785_s20 }
  0x3e   : > { %s26_s17 = ssub.s32 %s789_s21, %s939_s14  ;;  %p36_p13 = scmp.ne.s32.totalorder %s785_s20, %s781_s19 }
  0x3f   : > { %p27_p6 = scmp.eq.s32.totalorder %s26_s17, 0  ;;  %p37_p10 = scmp.eq.s32.totalorder %s789_s21, 0 }
  0x40   : > { %p1084_p3 = scmp.eq.s32.totalorder %s850_s22, 1  ;;  %p587_p7 = scmp.lt.s32.totalorder %s789_s21, 2 }
  0x41   : > { %s955_s27 = scalar_select %p27_p6, %s785_s20, %s29_s29  }
  0x42   : > { %p949_p5 = por %p1084_p3, %p36_p13  ;;  %p38_p9 = por %p37_p10, %p36_p13 }
  0x43   : > { %s208_s30 = sand.u32 1, %s785_s20   ;;  %s518_s6 = sshll.u32 %s789_s21, 7 }
  0x44   : > { %s1085_s23 = scalar_select %p949_p5, 1, 0 }
  0x45   : > { %s517_s7 = sshll.u32 %s208_s30, 3  ;;  %s962_s8 = scalar_lea.hbm %s1071_s0, %s518_s6 }
  0x46   : > { %s212_s9 = scalar_lea.vmem [#allocation2], %s517_s7  ;;  %p966_p11 = pnand %p587_p7, %p38_p9 }
  0x47   : > { %s219_s10 = sshll.u32 %s212_s9, 4  ;;  %s209_s28 = scalar_lea.sflag [#allocation3], %s208_s30  ;;  %s964_s10 = int_to_ptr.vmem [resolvable:$true] %s219_s10 }
  0x48   : > { %s689_s12 = scalar_lea.hbm %s962_s8, 128  ;;  %p691_p0 = pneg %p966_p11 }
  0x49   : > { %p690_p12 = scmp.ne.s32.totalorder %s962_s8, %s689_s12  ;;  %s694_s17 = scalar_lea.hbm %s1071_s0, 256 }
  0x4a   : > { %p695_p13 = scmp.lt.u32.totalorder %s962_s8, %s1071_s0  ;;  %p696_p6 = scmp.lt.u32.totalorder %s694_s17, %s689_s12 }
  0x4b   : > { %p692_p2 = pnand %p691_p0, %p690_p12  ;;  %p698_p3 = scmp.lt.u32.totalorder %s689_s12, %s962_s8 }
  0x4c   : > { %p697_p10 = por %p696_p6, %p695_p13 }
  0x4d   : > { %p693_p1 = pneg %p692_p2 }
  0x4e   : > { %p699_p7 = por %p698_p3, %p697_p10 }
  0x50   : > { %p700_p9 = pnand %p699_p7, %p693_p1 }
  0x52   : > { %703 = shalt.err (!%p700_p9)
}
  0x53   : > { %s704_s30 = scalar_lea.vmem %s964_s10, 128  ;;  %s795_s15 = smov [#allocation2]  }
  0x54   : > { %p705_p12 = scmp.ne.s32.totalorder %s964_s10, %s704_s30  ;;  %s709_s16 = sshll.u32 %s795_s15, 4  ;;  %s710_s16 = int_to_ptr.vmem [resolvable:$false] %s709_s16 }
  0x55   : > { %s711_s9 = scalar_lea.vmem %s710_s16, 256  ;;  %p712_p4 = scmp.lt.s32.totalorder %s964_s10, %s710_s16 }
  0x56   : > { %p707_p2 = pnand %p705_p12, %p691_p0  ;;  %p713_p13 = scmp.lt.s32.totalorder %s711_s9, %s704_s30 }
  0x58   : > { %p708_p5 = pneg %p707_p2  ;;  %p714_p6 = por %p713_p13, %p712_p4 }
  0x5a   : > { %p715_p10 = pnand %p714_p6, %p708_p5 }
  0x5c   : > { %718 = shalt.err (!%p715_p10)
}
  0x5d   : > { %580 = dma.hbm_to_vmem [thread:$0]  (!%p966_p11), %s962_s8, 128, %s964_s10, %s209_s28  }
  0x5e   : > { %228 = sbr.rel (%p869_p8) target bundleno = 563 (0x233), region = 40  ;;  %s998_s12 = sand.u32 (!%p869_p8), 1, %s781_s19  }
  0x5f   : > { %s520_s13 = sshll.u32 (!%p869_p8), %s998_s12, 3  ;;  %s231_s29 = scalar_lea.sflag (!%p869_p8), [#allocation3], %s998_s12 }
  0x60   : > { %s234_s17 = scalar_lea.vmem (!%p869_p8), [#allocation2], %s520_s13  ;;  %p1087_p4 = scmp.ne.s32.totalorder (!%p869_p8), %s1080_s24, 0 }
  0x65   : > { %764 = dma.done.wait (%p1087_p4), %s231_s29, 128  }
  0x66   : > { %766 = vsyncadd (%p1087_p4), %s231_s29, 4294967168  ;;  %p1088_p5 = scmp.eq.s32.totalorder %s850_s22, 0 }
  0x68   : > { %768 = dma.done.wait (%p1088_p5), [#allocation6], 512   ;;  %p1089_p8 = pmov %p1088_p5 }
  0x69   : > { %v796_v0 = vmov 0.0   ;;  %vm797_vm0 = vmmov 0   ;;  %v629_v1 = vld [vmem:[#allocation5] sm:$0xff]   ;;  %v630_v2 = vld [vmem:[#allocation5 + $0x8] sm:$0xff]   ;;  %v270_v3 = vld [vmem:[%s234_s17] sm:$0xff]  ;;  %vm295_vm1 = vcmask 261120  }
  0x6a   : > { %770 = vsyncadd (%p1089_p8), [#allocation6], 4294966784  ;;  %542 = vmatprep.subr.bf16.mxu0 %v796_v0  ;;  %546 = vmatprep.mubr.msk.bf16.mxu0 %vm797_vm0, %v796_v0  ;;  %v271_v4 = vpack.c.bf16 %v270_v3, %v270_v3  ;;  %v631_v5 = vld [vmem:[#allocation7] sm:$0xff]   ;;  %v632_v6 = vld [vmem:[#allocation7 + $0x8] sm:$0xff]   ;;  %s533_s11 = sshll.u32 %s850_s22, 7  ;;  %s268_s28 = scalar_lea.vmem [#allocation8], %s520_s13 }
  0x6b   : > { %550 = vmatprep.subr.bf16.mxu1 %v796_v0  ;;  %554 = vmatprep.mubr.msk.bf16.mxu1 %vm797_vm0, %v796_v0  ;;  %v524_v7 = vld [vmem:[%s1073_s2] ss:$0 sm:$0xff]  ;;  %s423_s7 = sshll.u32 %s268_s28, 4  ;;  %s1026_s15 = scalar_lea.hbm %s1076_s5, %s533_s11  ;;  %s1028_s7 = int_to_ptr.vmem [resolvable:$true] %s423_s7 }
  0x6c   : > { %543 = vmatpush3.bf16.msra.mxu0 %v629_v1  ;;  %551 = vmatpush3.bf16.msra.mxu1 %v631_v5  ;;  %v528_v15 = vld [vmem:[%s1075_s4] ss:$0 sm:$0xff]  ;;  %s410_s22 = scalar_lea.sflag [#allocation4], %s998_s12  ;;  %s719_s16 = scalar_lea.vmem %s1028_s7, 128 }
  0x6d   : > { %544 = vmatprep.subr.bf16.mxu0 %v796_v0  ;;  %552 = vmatprep.subr.bf16.mxu1 %v796_v0  ;;  %p720_p11 = scmp.ne.s32.totalorder %s1028_s7, %s719_s16  ;;  %p1090_p0 = scmp.ne.s32.totalorder %s1085_s23, 0 }
  0x6e   : > { %s798_s9 = smov [#allocation8]  }
  0x6f   : > { %p721_p1 = pnand %p720_p11, %p1090_p0  ;;  %s723_s13 = sshll.u32 %s798_s9, 4  ;;  %s724_s13 = int_to_ptr.vmem [resolvable:$false] %s723_s13 }
  0x70   : > { %545 = vmatpush3.bf16.msra.mxu0 %v630_v2  ;;  %553 = vmatpush3.bf16.msra.mxu1 %v632_v6  ;;  %s725_s29 = scalar_lea.vmem %s724_s13, 256  ;;  %p726_p7 = scmp.lt.s32.totalorder %s1028_s7, %s724_s13 }
  0x71   : > { %p722_p3 = pneg %p721_p1  ;;  %p727_p9 = scmp.lt.s32.totalorder %s725_s29, %s719_s16 }
  0x73   : > { %547 = vmatmul.mubr.msk.bf16.vlgmr.msra.gmra.mrb[0].mxu0 %vm295_vm1, %v271_v4  ;;  %p728_p12 = por %p727_p9, %p726_p7 }
  0x75   : > { %p729_p2 = pnand %p728_p12, %p722_p3 }
 0x146   : > { %v333_v8 = vpop.f32.mrb[0].mxu0 }
 0x147   : > { %v334_v9 = vadd.f32 %v524_v7, %v333_v8  ;;  %v548_v10 = vpop.f32.mrb[1].mxu0 }
 0x148   : > { %v336_v11 = vpop.f32.mrb[2].mxu0 }
 0x149   : > { %v339_v12 = vmax.f32 %v334_v9, 0.0  ;;  %v549_v13 = vpop.f32.mrb[3].mxu0 }
 0x14b   : > { %v340_v14 = vpack.c.bf16 %v339_v12, %v339_v12 }
 0x14d   : > { %555 = vmatmul.mubr.msk.bf16.vlgmr.msra.gmra.mrb[0].mxu1 %vm295_vm1, %v340_v14 }
 0x220   : > { %v401_v16 = vpop.f32.mrb[0].mxu1 }
 0x221   : > { %v402_v17 = vadd.f32 %v528_v15, %v401_v16  ;;  %v556_v18 = vpop.f32.mrb[1].mxu1 }
 0x222   : > { %v404_v19 = vpop.f32.mrb[2].mxu1 }
 0x223   : > { %v407_v20 = vadd.f32 %v402_v17, %v270_v3  ;;  %v557_v21 = vpop.f32.mrb[3].mxu1 }
 0x225   : > { %408 = vst.msk [vmem:[%s268_s28] sm:$0xff] %vm295_vm1, %v407_v20 }
 0x226   : > { %732 = shalt.err (!%p729_p2)
}
 0x227   : > { %s733_s12 = scalar_lea.hbm %s1026_s15, 128  ;;  %s737_s26 = scalar_lea.hbm %s1076_s5, 256 }
 0x228   : > { %p734_p13 = scmp.ne.s32.totalorder %s1026_s15, %s733_s12  ;;  %p738_p4 = scmp.lt.u32.totalorder %s1026_s15, %s1076_s5 }
 0x229   : > { %p739_p5 = scmp.lt.u32.totalorder %s737_s26, %s733_s12  ;;  %p741_p11 = scmp.lt.u32.totalorder %s733_s12, %s1026_s15 }
 0x22a   : > { %p735_p6 = pnand %p734_p13, %p1090_p0 }
 0x22b   : > { %p740_p8 = por %p739_p5, %p738_p4 }
 0x22c   : > { %p736_p10 = pneg %p735_p6 }
 0x22d   : > { %p742_p1 = por %p741_p11, %p740_p8 }
 0x22f   : > { %p743_p3 = pnand %p742_p1, %p736_p10 }
 0x231   : > { %746 = shalt.err (!%p743_p3)
}
 0x232   : > { %568 = dma.vmem_to_hbm [thread:$0]  (%p1090_p0), %s1028_s7, 128, %s1026_s15, %s410_s22  }
 0x233 PF: > { %s435_s11 = sand.u32 1, %s777_s18   ;;  %p1091_p7 = scmp.ne.s32.totalorder %s1081_s25, 0 }
 0x234   : > { %p1092_p9 = scmp.ge.s32.totalorder %s789_s21, 2  ;;  %s436_s28 = scalar_lea.sflag [#allocation4], %s435_s11 }
 0x236   : > { %p582_p12 = pnand %p1092_p9, %p1091_p7 }
 0x238   : > { %772 = dma.done.wait (!%p582_p12), %s436_s28, 128  }
 0x239   : > { %774 = vsyncadd (!%p582_p12), %s436_s28, 4294967168  ;;  %p19_p2 = scmp.ge.s32.totalorder %s939_s14, 4   ;;  %s1093_s18 = smov %s781_s19 }
 0x23a   : > { %s1094_s19 = smov %s785_s20  ;;  %s1095_s20 = smov %s955_s27 }
 0x23b   : > { %s1096_s21 = smov %s939_s14  ;;  %21 = sbr.rel (!%p19_p2) target bundleno = 6 (0x6), region = 93 }
 0x242   :  { %441 = vsyncpa [#allocation3], 1 }
 0x243   :  { %443 = vsyncpa [#allocation3 + $0x1], 1 }
 0x244   :  { %444 = vsyncpa [#allocation6], 1 }
 0x245   :  { %445 = vsyncpa [#allocation4], 1 }
 0x246   :  { %447 = vsyncpa [#allocation4 + $0x1], 1 }

// kernel: tpu_custom_call.1
= control target key start
LH: loop header
LB: loop body
LE: loop exit
PB: predicated region body
PF: predicated region fallthrough
CT: control target
= control target key end

     0   :  { %10 = vsyncpa [#allocation3], 0  ;;  %s1071_s0 = inlined_call_operand.hbm [shape: f32[16,32], index: 0, kind: input, shape index: {}]   ;;  %s1072_s1 = inlined_call_operand.hbm [shape: bf16[32,32], index: 1, kind: input, shape index: {}]   ;;  %s1073_s2 = inlined_call_operand.vmem [shape: f32[1,32], index: 2, kind: input, shape index: {}]   ;;  %s1074_s3 = inlined_call_operand.hbm [shape: bf16[32,32], index: 3, kind: input, shape index: {}]   ;;  %s1075_s4 = inlined_call_operand.vmem [shape: f32[1,32], index: 4, kind: input, shape index: {}]   ;;  %s1076_s5 = inlined_call_operand.hbm [shape: f32[16,32], index: 5, kind: output, shape index: {}]  }
   0x1   :  { %12 = vsyncpa [#allocation3 + $0x1], 0 }
   0x2   :  { %13 = vsyncpa [#allocation6], 0 }
   0x3   :  { %14 = vsyncpa [#allocation4], 0 }
   0x4   :  { %16 = vsyncpa [#allocation4 + $0x1], 0  ;;  %s829_s18 = smov 0   ;;  %s831_s19 = smov 0  }
   0x5   :  { %s833_s20 = smov 0   ;;  %s835_s21 = smov 0  }
   0x6 LB: > { %s850_s22 = sadd.s32 4294967295, %s789_s21   ;;  %s512_s23 = sadd.s32 4294967294, %s789_s21   ;;  %s789_s21 = sphi %s835_s21, %s1096_s21   ;;  %s785_s20 = sphi %s833_s20, %s1095_s20   ;;  %s781_s19 = sphi %s831_s19, %s1094_s19   ;;  %s777_s18 = sphi %s829_s18, %s1093_s18  }
   0x7   : > { %p42_p0 = scmp.ne.s32.totalorder %s781_s19, %s777_s18  ;;  %p1077_p1 = scmp.eq.s32.totalorder %s850_s22, 0 }
   0x8   : > { %p156_p3 = scmp.eq.s32.totalorder %s512_s23, 1  ;;  %p513_p5 = scmp.ge.s32.totalorder %s789_s21, 1 }
   0x9   : > { %p859_p4 = por %p1077_p1, %p42_p0  ;;  %p163_p7 = scmp.lt.s32.totalorder %s789_s21, 3 }
   0xa   : > { %p864_p6 = por %p156_p3, %p42_p0  ;;  %s791_s27 = smov [#allocation5]  }
   0xb   : > { %s1080_s24 = scalar_select %p859_p4, 1, 0 }
   0xc   : > { %s1081_s25 = scalar_select %p864_p6, 1, 0 }
   0xd   : > { %p869_p8 = pnand %p513_p5, %p163_p7  ;;  %s175_s28 = sshll.u32 %s791_s27, 4  ;;  %s873_s28 = int_to_ptr.vmem [resolvable:$true] %s175_s28 }
   0xe   : > { %s792_s30 = smov [#allocation7]   ;;  %s633_s9 = scalar_lea.hbm %s1072_s1, 256 }
   0xf   : > { %p570_p9 = pneg %p869_p8  ;;  %s191_s6 = sshll.u32 %s792_s30, 4  ;;  %s884_s6 = int_to_ptr.vmem [resolvable:$true] %s191_s6 }
  0x10   : > { %p634_p12 = scmp.ne.s32.totalorder %s1072_s1, %s633_s9  ;;  %p640_p5 = scmp.lt.u32.totalorder %s633_s9, %s1072_s1 }
  0x11   : > { %p880_p11 = pnand %p570_p9, %p1077_p1 }
  0x13   : > { %p635_p13 = pneg %p880_p11 }
  0x15   : > { %p636_p0 = pnand %p635_p13, %p634_p12 }
  0x17   : > { %p637_p3 = pneg %p636_p0 }
  0x19   : > { %p642_p7 = pnand %p640_p5, %p637_p3 }
  0x1b   : > { %645 = shalt.err (!%p642_p7)
}
  0x1c   : > { %s646_s14 = scalar_lea.vmem %s873_s28, 256  ;;  %p654_p2 = scmp.lt.s32.totalorder %s873_s28, %s873_s28 }
  0x1d   : > { %p647_p9 = scmp.ne.s32.totalorder %s873_s28, %s646_s14  ;;  %p655_p12 = scmp.lt.s32.totalorder %s646_s14, %s646_s14 }
  0x1f   : > { %p649_p10 = pnand %p647_p9, %p635_p13  ;;  %p656_p0 = por %p655_p12, %p654_p2 }
  0x21   : > { %p650_p1 = pneg %p649_p10 }
  0x23   : > { %p657_p6 = pnand %p656_p0, %p650_p1 }
  0x25   : > { %660 = shalt.err (!%p657_p6)
}
  0x26   : > { %s793_s15 = smov 64   ;;  %s794_s16 = smov 4  }
  0x27   : > { %573 = dma.hbm_to_vmem [thread:$0]  (!%p880_p11), %s1072_s1, 256, %s873_s28, [#allocation6], %s793_s15, %s793_s15, %s794_s16  }
  0x28   : > { %s661_s7 = scalar_lea.hbm %s1074_s3, 256 }
  0x29   : > { %p662_p2 = scmp.ne.s32.totalorder %s1074_s3, %s661_s7  ;;  %p668_p10 = scmp.lt.u32.totalorder %s661_s7, %s1074_s3 }
  0x2b   : > { %p664_p1 = pnand %p662_p2, %p635_p13 }
  0x2d   : > { %p665_p6 = pneg %p664_p1 }
  0x2f   : > { %p670_p3 = pnand %p668_p10, %p665_p6 }
  0x31   : > { %673 = shalt.err (!%p670_p3)
}
  0x32   : > { %s674_s28 = scalar_lea.vmem %s884_s6, 256  ;;  %p682_p12 = scmp.lt.s32.totalorder %s884_s6, %s884_s6 }
  0x33   : > { %p675_p5 = scmp.ne.s32.totalorder %s884_s6, %s674_s28  ;;  %p683_p0 = scmp.lt.s32.totalorder %s674_s28, %s674_s28 }
  0x35   : > { %p677_p7 = pnand %p675_p5, %p635_p13  ;;  %p684_p2 = por %p683_p0, %p682_p12 }
  0x37   : > { %p678_p9 = pneg %p677_p7 }
  0x39   : > { %p685_p1 = pnand %p684_p2, %p678_p9 }
  0x3b   : > { %688 = shalt.err (!%p685_p1)
}
  0x3c   : > { %576 = dma.hbm_to_vmem [thread:$0]  (!%p880_p11), %s1074_s3, 256, %s884_s6, [#allocation6], %s793_s15, %s793_s15, %s794_s16  }
  0x3d   : > { %s939_s14 = sadd.s32 1, %s789_s21   ;;  %s29_s29 = sadd.s32 1, %s785_s20 }
  0x3e   : > { %s26_s17 = ssub.s32 %s789_s21, %s939_s14  ;;  %p36_p13 = scmp.ne.s32.totalorder %s785_s20, %s781_s19 }
  0x3f   : > { %p27_p6 = scmp.eq.s32.totalorder %s26_s17, 0  ;;  %p37_p10 = scmp.eq.s32.totalorder %s789_s21, 0 }
  0x40   : > { %p1084_p3 = scmp.eq.s32.totalorder %s850_s22, 1  ;;  %p587_p7 = scmp.lt.s32.totalorder %s789_s21, 2 }
  0x41   : > { %s955_s27 = scalar_select %p27_p6, %s785_s20, %s29_s29  }
  0x42   : > { %p949_p5 = por %p1084_p3, %p36_p13  ;;  %p38_p9 = por %p37_p10, %p36_p13 }
  0x43   : > { %s208_s30 = sand.u32 1, %s785_s20   ;;  %s518_s6 = sshll.u32 %s789_s21, 7 }
  0x44   : > { %s1085_s23 = scalar_select %p949_p5, 1, 0 }
  0x45   : > { %s517_s7 = sshll.u32 %s208_s30, 3  ;;  %s962_s8 = scalar_lea.hbm %s1071_s0, %s518_s6 }
  0x46   : > { %s212_s9 = scalar_lea.vmem [#allocation2], %s517_s7  ;;  %p966_p11 = pnand %p587_p7, %p38_p9 }
  0x47   : > { %s219_s10 = sshll.u32 %s212_s9, 4  ;;  %s209_s28 = scalar_lea.sflag [#allocation3], %s208_s30  ;;  %s964_s10 = int_to_ptr.vmem [resolvable:$true] %s219_s10 }
  0x48   : > { %s689_s12 = scalar_lea.hbm %s962_s8, 128  ;;  %p691_p0 = pneg %p966_p11 }
  0x49   : > { %p690_p12 = scmp.ne.s32.totalorder %s962_s8, %s689_s12  ;;  %s694_s17 = scalar_lea.hbm %s1071_s0, 256 }
  0x4a   : > { %p695_p13 = scmp.lt.u32.totalorder %s962_s8, %s1071_s0  ;;  %p696_p6 = scmp.lt.u32.totalorder %s694_s17, %s689_s12 }
  0x4b   : > { %p692_p2 = pnand %p691_p0, %p690_p12  ;;  %p698_p3 = scmp.lt.u32.totalorder %s689_s12, %s962_s8 }
  0x4c   : > { %p697_p10 = por %p696_p6, %p695_p13 }
  0x4d   : > { %p693_p1 = pneg %p692_p2 }
  0x4e   : > { %p699_p7 = por %p698_p3, %p697_p10 }
  0x50   : > { %p700_p9 = pnand %p699_p7, %p693_p1 }
  0x52   : > { %703 = shalt.err (!%p700_p9)
}
  0x53   : > { %s704_s30 = scalar_lea.vmem %s964_s10, 128  ;;  %s795_s15 = smov [#allocation2]  }
  0x54   : > { %p705_p12 = scmp.ne.s32.totalorder %s964_s10, %s704_s30  ;;  %s709_s16 = sshll.u32 %s795_s15, 4  ;;  %s710_s16 = int_to_ptr.vmem [resolvable:$false] %s709_s16 }
  0x55   : > { %s711_s9 = scalar_lea.vmem %s710_s16, 256  ;;  %p712_p4 = scmp.lt.s32.totalorder %s964_s10, %s710_s16 }
  0x56   : > { %p707_p2 = pnand %p705_p12, %p691_p0  ;;  %p713_p13 = scmp.lt.s32.totalorder %s711_s9, %s704_s30 }
  0x58   : > { %p708_p5 = pneg %p707_p2  ;;  %p714_p6 = por %p713_p13, %p712_p4 }
  0x5a   : > { %p715_p10 = pnand %p714_p6, %p708_p5 }
  0x5c   : > { %718 = shalt.err (!%p715_p10)
}
  0x5d   : > { %580 = dma.hbm_to_vmem [thread:$0]  (!%p966_p11), %s962_s8, 128, %s964_s10, %s209_s28  }
  0x5e   : > { %228 = sbr.rel (%p869_p8) target bundleno = 563 (0x233), region = 40  ;;  %s998_s12 = sand.u32 (!%p869_p8), 1, %s781_s19  }
  0x5f   : > { %s520_s13 = sshll.u32 (!%p869_p8), %s998_s12, 3  ;;  %s231_s29 = scalar_lea.sflag (!%p869_p8), [#allocation3], %s998_s12 }
  0x60   : > { %s234_s17 = scalar_lea.vmem (!%p869_p8), [#allocation2], %s520_s13  ;;  %p1087_p4 = scmp.ne.s32.totalorder (!%p869_p8), %s1080_s24, 0 }
  0x65   : > { %764 = dma.done.wait (%p1087_p4), %s231_s29, 128  }
  0x66   : > { %766 = vsyncadd (%p1087_p4), %s231_s29, 4294967168  ;;  %p1088_p5 = scmp.eq.s32.totalorder %s850_s22, 0 }
  0x68   : > { %768 = dma.done.wait (%p1088_p5), [#allocation6], 512   ;;  %p1089_p8 = pmov %p1088_p5 }
  0x69   : > { %v796_v0 = vmov 0.0   ;;  %vm797_vm0 = vmmov 0   ;;  %v629_v1 = vld [vmem:[#allocation5] sm:$0xff]   ;;  %v630_v2 = vld [vmem:[#allocation5 + $0x8] sm:$0xff]   ;;  %v270_v3 = vld [vmem:[%s234_s17] sm:$0xff]  ;;  %vm295_vm1 = vcmask 261120  }
  0x6a   : > { %770 = vsyncadd (%p1089_p8), [#allocation6], 4294966784  ;;  %542 = vmatprep.subr.bf16.mxu0 %v796_v0  ;;  %546 = vmatprep.mubr.msk.bf16.mxu0 %vm797_vm0, %v796_v0  ;;  %v271_v4 = vpack.c.bf16 %v270_v3, %v270_v3  ;;  %v631_v5 = vld [vmem:[#allocation7] sm:$0xff]   ;;  %v632_v6 = vld [vmem:[#allocation7 + $0x8] sm:$0xff]   ;;  %s533_s11 = sshll.u32 %s850_s22, 7  ;;  %s268_s28 = scalar_lea.vmem [#allocation8], %s520_s13 }
  0x6b   : > { %550 = vmatprep.subr.bf16.mxu1 %v796_v0  ;;  %554 = vmatprep.mubr.msk.bf16.mxu1 %vm797_vm0, %v796_v0  ;;  %v524_v7 = vld [vmem:[%s1073_s2] ss:$0 sm:$0xff]  ;;  %s423_s7 = sshll.u32 %s268_s28, 4  ;;  %s1026_s15 = scalar_lea.hbm %s1076_s5, %s533_s11  ;;  %s1028_s7 = int_to_ptr.vmem [resolvable:$true] %s423_s7 }
  0x6c   : > { %543 = vmatpush3.bf16.msra.mxu0 %v629_v1  ;;  %551 = vmatpush3.bf16.msra.mxu1 %v631_v5  ;;  %v528_v15 = vld [vmem:[%s1075_s4] ss:$0 sm:$0xff]  ;;  %s410_s22 = scalar_lea.sflag [#allocation4], %s998_s12  ;;  %s719_s16 = scalar_lea.vmem %s1028_s7, 128 }
  0x6d   : > { %544 = vmatprep.subr.bf16.mxu0 %v796_v0  ;;  %552 = vmatprep.subr.bf16.mxu1 %v796_v0  ;;  %p720_p11 = scmp.ne.s32.totalorder %s1028_s7, %s719_s16  ;;  %p1090_p0 = scmp.ne.s32.totalorder %s1085_s23, 0 }
  0x6e   : > { %s798_s9 = smov [#allocation8]  }
  0x6f   : > { %p721_p1 = pnand %p720_p11, %p1090_p0  ;;  %s723_s13 = sshll.u32 %s798_s9, 4  ;;  %s724_s13 = int_to_ptr.vmem [resolvable:$false] %s723_s13 }
  0x70   : > { %545 = vmatpush3.bf16.msra.mxu0 %v630_v2  ;;  %553 = vmatpush3.bf16.msra.mxu1 %v632_v6  ;;  %s725_s29 = scalar_lea.vmem %s724_s13, 256  ;;  %p726_p7 = scmp.lt.s32.totalorder %s1028_s7, %s724_s13 }
  0x71   : > { %p722_p3 = pneg %p721_p1  ;;  %p727_p9 = scmp.lt.s32.totalorder %s725_s29, %s719_s16 }
  0x73   : > { %547 = vmatmul.mubr.msk.bf16.vlgmr.msra.gmra.mrb[0].mxu0 %vm295_vm1, %v271_v4  ;;  %p728_p12 = por %p727_p9, %p726_p7 }
  0x75   : > { %p729_p2 = pnand %p728_p12, %p722_p3 }
 0x146   : > { %v333_v8 = vpop.f32.mrb[0].mxu0 }
 0x147   : > { %v334_v9 = vadd.f32 %v524_v7, %v333_v8  ;;  %v548_v10 = vpop.f32.mrb[1].mxu0 }
 0x148   : > { %v336_v11 = vpop.f32.mrb[2].mxu0 }
 0x149   : > { %v339_v12 = vmax.f32 %v334_v9, 0.0  ;;  %v549_v13 = vpop.f32.mrb[3].mxu0 }
 0x14b   : > { %v340_v14 = vpack.c.bf16 %v339_v12, %v339_v12 }
 0x14d   : > { %555 = vmatmul.mubr.msk.bf16.vlgmr.msra.gmra.mrb[0].mxu1 %vm295_vm1, %v340_v14 }
 0x220   : > { %v401_v16 = vpop.f32.mrb[0].mxu1 }
 0x221   : > { %v402_v17 = vadd.f32 %v528_v15, %v401_v16  ;;  %v556_v18 = vpop.f32.mrb[1].mxu1 }
 0x222   : > { %v404_v19 = vpop.f32.mrb[2].mxu1 }
 0x223   : > { %v407_v20 = vadd.f32 %v402_v17, %v270_v3  ;;  %v557_v21 = vpop.f32.mrb[3].mxu1 }
 0x225   : > { %408 = vst.msk [vmem:[%s268_s28] sm:$0xff] %vm295_vm1, %v407_v20 }
 0x226   : > { %732 = shalt.err (!%p729_p2)
}
 0x227   : > { %s733_s12 = scalar_lea.hbm %s1026_s15, 128  ;;  %s737_s26 = scalar_lea.hbm %s1076_s5, 256 }
 0x228   : > { %p734_p13 = scmp.ne.s32.totalorder %s1026_s15, %s733_s12  ;;  %p738_p4 = scmp.lt.u32.totalorder %s1026_s15, %s1076_s5 }
 0x229   : > { %p739_p5 = scmp.lt.u32.totalorder %s737_s26, %s733_s12  ;;  %p741_p11 = scmp.lt.u32.totalorder %s733_s12, %s1026_s15 }
 0x22a   : > { %p735_p6 = pnand %p734_p13, %p1090_p0 }
 0x22b   : > { %p740_p8 = por %p739_p5, %p738_p4 }
 0x22c   : > { %p736_p10 = pneg %p735_p6 }
 0x22d   : > { %p742_p1 = por %p741_p11, %p740_p8 }
 0x22f   : > { %p743_p3 = pnand %p742_p1, %p736_p10 }
 0x231   : > { %746 = shalt.err (!%p743_p3)
}
 0x232   : > { %568 = dma.vmem_to_hbm [thread:$0]  (%p1090_p0), %s1028_s7, 128, %s1026_s15, %s410_s22  }
 0x233 PF: > { %s435_s11 = sand.u32 1, %s777_s18   ;;  %p1091_p7 = scmp.ne.s32.totalorder %s1081_s25, 0 }
 0x234   : > { %p1092_p9 = scmp.ge.s32.totalorder %s789_s21, 2  ;;  %s436_s28 = scalar_lea.sflag [#allocation4], %s435_s11 }
 0x236   : > { %p582_p12 = pnand %p1092_p9, %p1091_p7 }
 0x238   : > { %772 = dma.done.wait (!%p582_p12), %s436_s28, 128  }
 0x239   : > { %774 = vsyncadd (!%p582_p12), %s436_s28, 4294967168  ;;  %p19_p2 = scmp.ge.s32.totalorder %s939_s14, 4   ;;  %s1093_s18 = smov %s781_s19 }
 0x23a   : > { %s1094_s19 = smov %s785_s20  ;;  %s1095_s20 = smov %s955_s27 }
 0x23b   : > { %s1096_s21 = smov %s939_s14  ;;  %21 = sbr.rel (!%p19_p2) target bundleno = 6 (0x6), region = 93 }
 0x242   :  { %441 = vsyncpa [#allocation3], 1 }
 0x243   :  { %443 = vsyncpa [#allocation3 + $0x1], 1 }
 0x244   :  { %444 = vsyncpa [#allocation6], 1 }
 0x245   :  { %445 = vsyncpa [#allocation4], 1 }
 0x246   :  { %447 = vsyncpa [#allocation4 + $0x1], 1 }

</bundles_post_ra>
